<compile_context>
chip_gen: v5e
topology: v5e:2x2
jax: 0.10.0
libtpu: 0.0.40
codegen_flags: <defaults>
</compile_context>

<pallas_src>
import functools

import jax
import jax.numpy as jnp
from jax.experimental import pallas as pl
from jax.experimental.pallas import tpu as pltpu


def _round_up(x, m):
    return (x + m - 1) // m * m


def _cdiv(a, b):
    return (a + b - 1) // b


# ----------------------------------------------------------------------------
# Pallas kernel: one row-tile of tokens -> partitioned FFN + residual + LN.
# ----------------------------------------------------------------------------
def _ppff_kernel(x_ref, w1c_ref, w1p_ref, w2c_ref, w2p_ref,
                 b1_ref, rows_ref, o_ref, *, eps):
    f32 = jnp.float32
    bf16 = jnp.bfloat16

    d_content, d_ff2 = w1c_ref.shape
    d_hid = x_ref.shape[1]

    x = x_ref[...]                       # (tn, d_hid), io dtype (f32 or bf16)
    xc = x[:, :d_content]                # content half
    xp = x[:, d_content:]                # positional half
    # TODO(synk): if d_content is not a multiple of 128 these slices and the
    # split stores below lower to masked / lane-shuffled ops; real parser
    # configs (d_content = d_positional = 512) are lane-clean.

    b1 = b1_ref[...]                     # (1, d_ff)   = [b_1c | b_1p]
    rows = rows_ref[...]                 # (3, d_hid)  = [b2; gamma; beta]
    b2 = rows[0:1, :]
    gamma = rows[1:2, :]
    beta = rows[2:3, :]

    # --- partitioned position-wise FFN (content / positional branches) ------
    # dot -> +bias -> relu -> bf16 fused so only the bf16 hidden activation
    # materializes between the two matmul chains.
    hc = jax.nn.relu(
        jnp.dot(xc.astype(bf16), w1c_ref[...], preferred_element_type=f32)
        + b1[:, :d_ff2]).astype(bf16)
    hp = jax.nn.relu(
        jnp.dot(xp.astype(bf16), w1p_ref[...], preferred_element_type=f32)
        + b1[:, d_ff2:]).astype(bf16)
    # TODO(synk): FeatureDropout(relu_dropout / residual_dropout) are
    # train-time stochastic per-batch-element feature masks (driven by
    # batch_idxs); implemented as eval-mode identity.

    yc = xc.astype(f32) + (jnp.dot(hc, w2c_ref[...], preferred_element_type=f32)
                           + b2[:, :d_content])
    yp = xp.astype(f32) + (jnp.dot(hp, w2p_ref[...], preferred_element_type=f32)
                           + b2[:, d_content:])

    # --- LayerNormalization: torch.std is unbiased (ddof=1), eps on sigma ---
    mu = (jnp.sum(yc, axis=-1, keepdims=True)
          + jnp.sum(yp, axis=-1, keepdims=True)) * (1.0 / d_hid)
    dc = yc - mu
    dp = yp - mu
    var = (jnp.sum(dc * dc, axis=-1, keepdims=True)
           + jnp.sum(dp * dp, axis=-1, keepdims=True)) * (1.0 / (d_hid - 1))
    inv = pl.reciprocal(jnp.sqrt(var) + eps, approx=True)   # EUP slot, ~free

    o_ref[:, :d_content] = (dc * inv * gamma[:, :d_content]
                            + beta[:, :d_content]).astype(o_ref.dtype)
    o_ref[:, d_content:] = (dp * inv * gamma[:, d_content:]
                            + beta[:, d_content:]).astype(o_ref.dtype)


# ----------------------------------------------------------------------------
# Parameter packing — done ONCE per parameter set (hoisted out of the
# per-call path).
# ----------------------------------------------------------------------------
def prepare_params(p, matmul_dtype=jnp.bfloat16):
    b1 = jnp.concatenate([p["b_1c"], p["b_1p"]])[None, :].astype(jnp.float32)
    rows = jnp.stack(
        [jnp.concatenate([p["b_2c"], p["b_2p"]]), p["ln_a"], p["ln_b"]],
        axis=0).astype(jnp.float32)
    return {
        "w1c": p["w_1c"].astype(matmul_dtype),
        "w1p": p["w_1p"].astype(matmul_dtype),
        "w2c": p["w_2c"].astype(matmul_dtype),
        "w2p": p["w_2p"].astype(matmul_dtype),
        "b1": b1,
        "rows": rows,
        "eps": float(p["eps"]),
    }


# ----------------------------------------------------------------------------
# Rough per-call VMEM estimate (bytes) for row tile `tn`.
# ----------------------------------------------------------------------------
def _vmem_estimate(tn, d_hid, d_ff2, io_bytes, weight_bufs):
    act = 2 * 2 * tn * d_hid * io_bytes                # x + out tiles, 2-buffered
    weights = 2 * d_hid * d_ff2 * 2                    # 4 bf16 weight mats
    small = (2 * d_ff2 + 3 * d_hid) * 4                # b1 + [b2; gamma; beta]
    temps = 2 * tn * d_ff2 * 4 + 4 * tn * d_hid * 4    # f32 hidden + LN temporaries
    return act + weight_bufs * (weights + small) + temps + (2 << 20)


# ----------------------------------------------------------------------------
# Wrapper: row-tiled pallas_call (no wrapper-side pad / astype copies).
# ----------------------------------------------------------------------------
def partitioned_ffn_forward(x, prep, *, block_rows=256,
                            vmem_budget_bytes=40 << 20):
    n, d_hid = x.shape
    d_ff2 = prep["w1c"].shape[1]
    io_dtype = x.dtype                       # bf16 recommended on v6e/v7x, f32 on v5e
    io_bytes = jnp.dtype(io_dtype).itemsize

    # --- row-tile selection --------------------------------------------------
    tn = max(8, min(block_rows, _round_up(n, 8)))
    # keep estimated VMEM under budget (v7x: 64 MiB physical / 32 MiB scoped default)
    while tn > 8 and _vmem_estimate(tn, d_hid, d_ff2, io_bytes, 2) > vmem_budget_bytes:
        tn = max(8, _round_up(tn // 2, 8))
    # v7x megacore: make sure there are >= 2 row tiles so both TensorCores work
    if _cdiv(n, tn) < 2 and n > 8:
        tn = min(tn, _round_up(_cdiv(n, 2), 8))
    grid = (_cdiv(n, tn),)

    est = _vmem_estimate(tn, d_hid, d_ff2, io_bytes, 2)
    cp_kwargs = dict(dimension_semantics=("parallel",))
    if est > (12 << 20):                      # above small scoped defaults -> be explicit
        cp_kwargs["vmem_limit_bytes"] = int(min(max(est * 5 // 4, 24 << 20), 48 << 20))
    compiler_params = pltpu.CompilerParams(**cp_kwargs)

    kernel = functools.partial(_ppff_kernel, eps=prep["eps"])
    operands = (x, prep["w1c"], prep["w1p"], prep["w2c"], prep["w2p"],
                prep["b1"], prep["rows"])

    def build_call(weight_buffers):
        def resident(shape):
            kw = {}
            if weight_buffers is not None:
                kw["pipeline_mode"] = pl.Buffered(weight_buffers)
            return pl.BlockSpec(shape, lambda i: (0, 0), **kw)   # constant index -> resident

        return pl.pallas_call(
            kernel,
            out_shape=jax.ShapeDtypeStruct((n, d_hid), io_dtype),
            grid_spec=pltpu.PrefetchScalarGridSpec(
                num_scalar_prefetch=0,
                grid=grid,
                in_specs=[
                    pl.BlockSpec((tn, d_hid), lambda i: (i, 0)),   # x row tile
                    resident(prep["w1c"].shape),
                    resident(prep["w1p"].shape),
                    resident(prep["w2c"].shape),
                    resident(prep["w2p"].shape),
                    resident(prep["b1"].shape),
                    resident(prep["rows"].shape),
                ],
                out_specs=pl.BlockSpec((tn, d_hid), lambda i: (i, 0)),
            ),
            compiler_params=compiler_params,
        )

    # Resident weights never change across the grid -> single-buffer them to
    # free VMEM for bigger row tiles; fall back to default double-buffering
    # if this Pallas build rejects pl.Buffered(1).
    if hasattr(pl, "Buffered"):
        try:
            return build_call(1)(*operands)
        except Exception:
            pass
    return build_call(None)(*operands)


# ----------------------------------------------------------------------------
# Deterministic synthetic parameter init (math layout: (in_dim, out_dim)).
# ----------------------------------------------------------------------------
def init_params(key, d_hid, d_ff, d_positional):
    d_content = d_hid - d_positional
    d_ff2 = d_ff // 2
    ks = jax.random.split(key, 10)
    u = lambda k, shape, s: jax.random.uniform(k, shape, jnp.float32, -s, s)
    return {
        "w_1c": u(ks[0], (d_content, d_ff2), 0.2),
        "b_1c": u(ks[1], (d_ff2,), 0.1),
        "w_1p": u(ks[2], (d_positional, d_ff2), 0.2),
        "b_1p": u(ks[3], (d_ff2,), 0.1),
        "w_2c": u(ks[4], (d_ff2, d_content), 0.2),
        "b_2c": u(ks[5], (d_content,), 0.1),
        "w_2p": u(ks[6], (d_ff2, d_positional), 0.2),
        "b_2p": u(ks[7], (d_positional,), 0.1),
        # LayerNormalization affine params (perturbed so the test is non-trivial)
        "ln_a": 1.0 + 0.1 * jax.random.normal(ks[8], (d_hid,), jnp.float32),
        "ln_b": 0.1 * jax.random.normal(ks[9], (d_hid,), jnp.float32),
        "eps": 1e-3,
    }


# ----------------------------------------------------------------------------
# Pure-JAX reference (mirrors the PyTorch forward in eval mode).
# ----------------------------------------------------------------------------
def ref_forward(x, p):
    d_content = p["w_1c"].shape[0]
    xc = x[:, :d_content]
    xp = x[:, d_content:]
    oc = jax.nn.relu(xc @ p["w_1c"] + p["b_1c"]) @ p["w_2c"] + p["b_2c"]
    op = jax.nn.relu(xp @ p["w_1p"] + p["b_1p"]) @ p["w_2p"] + p["b_2p"]
    y = jnp.concatenate([oc, op], axis=-1) + x
    mu = jnp.mean(y, axis=-1, keepdims=True)
    sigma = jnp.std(y, axis=-1, keepdims=True, ddof=1)      # torch.std: unbiased
    out = (y - mu) / (sigma + p["eps"])
    return out * p["ln_a"] + p["ln_b"]


if __name__ == "__main__":
    # small shapes consistent with the module:
    #   n_tokens=24, d_hid=32, d_ff=64, d_positional=8  (d_content=24)
    N, D_HID, D_FF, D_POS = 24, 32, 64, 8

    key = jax.random.PRNGKey(0)
    kx, kp = jax.random.split(key)
    x = jax.random.normal(kx, (N, D_HID), jnp.float32)
    params = init_params(kp, D_HID, D_FF, D_POS)

    prep = prepare_params(params)                 # built once per parameter set
    ref = ref_forward(x, params)

    # f32 activation streaming (v5e-style path).  Also exercises the un-padded
    # partial last tile: 24 rows -> 2 tiles of 16 rows, second tile masked.
    out = partitioned_ffn_forward(x, prep, block_rows=256)
    jax.block_until_ready(out)
    assert out.shape == (N, D_HID) and out.dtype == jnp.float32
    max_err = float(jnp.max(jnp.abs(out - ref)))
    # bf16 matmul inputs with f32 accumulation -> loose-ish tolerance
    assert jnp.allclose(out, ref, rtol=2e-2, atol=2e-2), max_err

    # bf16 activation streaming (recommended on v6e / v7x: halves x/out HBM traffic).
    out_bf16 = partitioned_ffn_forward(x.astype(jnp.bfloat16), prep, block_rows=256)
    jax.block_until_ready(out_bf16)
    assert out_bf16.shape == (N, D_HID) and out_bf16.dtype == jnp.bfloat16
    out_bf16_f32 = out_bf16.astype(jnp.float32)
    assert bool(jnp.all(jnp.isfinite(out_bf16_f32)))
    assert jnp.allclose(out_bf16_f32, ref, rtol=1e-1, atol=1e-1)

    print("KERNEL_OK")
</pallas_src>

<mosaic_0001>
module attributes {stable_mosaic.version = 11 : i64} {
  func.func @_ppff_kernel(%arg0: i32, %arg1: memref<16x32xf32, #tpu.memory_space<vmem>>, %arg2: memref<24x32xbf16, #tpu.memory_space<vmem>>, %arg3: memref<8x32xbf16, #tpu.memory_space<vmem>>, %arg4: memref<32x24xbf16, #tpu.memory_space<vmem>>, %arg5: memref<32x8xbf16, #tpu.memory_space<vmem>>, %arg6: memref<1x64xf32, #tpu.memory_space<vmem>>, %arg7: memref<3x32xf32, #tpu.memory_space<vmem>>, %arg8: memref<16x32xf32, #tpu.memory_space<vmem>>) attributes {dimension_semantics = [#tpu.dimension_semantics<parallel>], iteration_bounds = array<i64: 2>, scalar_prefetch = 0 : i64, scratch_operands = 0 : i64, tpu.core_type = #tpu.core_type<tc>, window_params = [{transform_indices = @transform_0, window_bounds = array<i64: 16, 32>}, {pipeline_mode = #tpu.pipeline_mode<synchronous>, transform_indices = @transform_1, window_bounds = array<i64: 24, 32>}, {pipeline_mode = #tpu.pipeline_mode<synchronous>, transform_indices = @transform_2, window_bounds = array<i64: 8, 32>}, {pipeline_mode = #tpu.pipeline_mode<synchronous>, transform_indices = @transform_3, window_bounds = array<i64: 32, 24>}, {pipeline_mode = #tpu.pipeline_mode<synchronous>, transform_indices = @transform_4, window_bounds = array<i64: 32, 8>}, {pipeline_mode = #tpu.pipeline_mode<synchronous>, transform_indices = @transform_5, window_bounds = array<i64: 1, 64>}, {pipeline_mode = #tpu.pipeline_mode<synchronous>, transform_indices = @transform_6, window_bounds = array<i64: 3, 32>}, {transform_indices = @transform_7, window_bounds = array<i64: 16, 32>}]} {
    %c0 = arith.constant 0 : index
    %c0_0 = arith.constant 0 : index
    %0 = vector.load %arg1[%c0, %c0_0] : memref<16x32xf32, #tpu.memory_space<vmem>>, vector<16x32xf32>
    %1 = vector.extract_strided_slice %0 {offsets = [0, 0], sizes = [16, 24], strides = [1, 1]} : vector<16x32xf32> to vector<16x24xf32>
    %2 = vector.extract_strided_slice %0 {offsets = [0, 24], sizes = [16, 8], strides = [1, 1]} : vector<16x32xf32> to vector<16x8xf32>
    %c0_1 = arith.constant 0 : index
    %c0_2 = arith.constant 0 : index
    %3 = vector.load %arg6[%c0_1, %c0_2] : memref<1x64xf32, #tpu.memory_space<vmem>>, vector<1x64xf32>
    %c0_3 = arith.constant 0 : index
    %c0_4 = arith.constant 0 : index
    %4 = vector.load %arg7[%c0_3, %c0_4] : memref<3x32xf32, #tpu.memory_space<vmem>>, vector<3x32xf32>
    %5 = vector.extract_strided_slice %4 {offsets = [0, 0], sizes = [1, 32], strides = [1, 1]} : vector<3x32xf32> to vector<1x32xf32>
    %6 = vector.extract_strided_slice %4 {offsets = [1, 0], sizes = [1, 32], strides = [1, 1]} : vector<3x32xf32> to vector<1x32xf32>
    %7 = vector.extract_strided_slice %4 {offsets = [2, 0], sizes = [1, 32], strides = [1, 1]} : vector<3x32xf32> to vector<1x32xf32>
    %8 = arith.truncf %1 : vector<16x24xf32> to vector<16x24xbf16>
    %c0_5 = arith.constant 0 : index
    %c0_6 = arith.constant 0 : index
    %9 = vector.load %arg2[%c0_5, %c0_6] : memref<24x32xbf16, #tpu.memory_space<vmem>>, vector<24x32xbf16>
    %cst = arith.constant dense<0.000000e+00> : vector<16x32xf32>
    %10 = tpu.matmul %8, %9, %cst {dimension_numbers = #tpu.dot_dimension_numbers<[1], [0], [0], [1], [0, 0, 1, 1], [], []>} : vector<16x24xbf16>, vector<24x32xbf16>, vector<16x32xf32> -> vector<16x32xf32>
    %11 = vector.extract_strided_slice %3 {offsets = [0, 0], sizes = [1, 32], strides = [1, 1]} : vector<1x64xf32> to vector<1x32xf32>
    %12 = vector.broadcast %11 : vector<1x32xf32> to vector<16x32xf32>
    %13 = arith.addf %10, %12 : vector<16x32xf32>
    %cst_7 = arith.constant 0.000000e+00 : f32
    %14 = vector.broadcast %cst_7 : f32 to vector<16x32xf32>
    %15 = arith.maximumf %13, %14 : vector<16x32xf32>
    %16 = arith.truncf %15 : vector<16x32xf32> to vector<16x32xbf16>
    %17 = arith.truncf %2 : vector<16x8xf32> to vector<16x8xbf16>
    %c0_8 = arith.constant 0 : index
    %c0_9 = arith.constant 0 : index
    %18 = vector.load %arg3[%c0_8, %c0_9] : memref<8x32xbf16, #tpu.memory_space<vmem>>, vector<8x32xbf16>
    %cst_10 = arith.constant dense<0.000000e+00> : vector<16x32xf32>
    %19 = tpu.matmul %17, %18, %cst_10 {dimension_numbers = #tpu.dot_dimension_numbers<[1], [0], [0], [1], [0, 0, 1, 1], [], []>} : vector<16x8xbf16>, vector<8x32xbf16>, vector<16x32xf32> -> vector<16x32xf32>
    %20 = vector.extract_strided_slice %3 {offsets = [0, 32], sizes = [1, 32], strides = [1, 1]} : vector<1x64xf32> to vector<1x32xf32>
    %21 = vector.broadcast %20 : vector<1x32xf32> to vector<16x32xf32>
    %22 = arith.addf %19, %21 : vector<16x32xf32>
    %cst_11 = arith.constant 0.000000e+00 : f32
    %23 = vector.broadcast %cst_11 : f32 to vector<16x32xf32>
    %24 = arith.maximumf %22, %23 : vector<16x32xf32>
    %25 = arith.truncf %24 : vector<16x32xf32> to vector<16x32xbf16>
    %c0_12 = arith.constant 0 : index
    %c0_13 = arith.constant 0 : index
    %26 = vector.load %arg4[%c0_12, %c0_13] : memref<32x24xbf16, #tpu.memory_space<vmem>>, vector<32x24xbf16>
    %cst_14 = arith.constant dense<0.000000e+00> : vector<16x24xf32>
    %27 = tpu.matmul %16, %26, %cst_14 {dimension_numbers = #tpu.dot_dimension_numbers<[1], [0], [0], [1], [0, 0, 1, 1], [], []>} : vector<16x32xbf16>, vector<32x24xbf16>, vector<16x24xf32> -> vector<16x24xf32>
    %28 = vector.extract_strided_slice %5 {offsets = [0, 0], sizes = [1, 24], strides = [1, 1]} : vector<1x32xf32> to vector<1x24xf32>
    %29 = vector.broadcast %28 : vector<1x24xf32> to vector<16x24xf32>
    %30 = arith.addf %27, %29 : vector<16x24xf32>
    %31 = arith.addf %1, %30 : vector<16x24xf32>
    %c0_15 = arith.constant 0 : index
    %c0_16 = arith.constant 0 : index
    %32 = vector.load %arg5[%c0_15, %c0_16] : memref<32x8xbf16, #tpu.memory_space<vmem>>, vector<32x8xbf16>
    %cst_17 = arith.constant dense<0.000000e+00> : vector<16x8xf32>
    %33 = tpu.matmul %25, %32, %cst_17 {dimension_numbers = #tpu.dot_dimension_numbers<[1], [0], [0], [1], [0, 0, 1, 1], [], []>} : vector<16x32xbf16>, vector<32x8xbf16>, vector<16x8xf32> -> vector<16x8xf32>
    %34 = vector.extract_strided_slice %5 {offsets = [0, 24], sizes = [1, 8], strides = [1, 1]} : vector<1x32xf32> to vector<1x8xf32>
    %35 = vector.broadcast %34 : vector<1x8xf32> to vector<16x8xf32>
    %36 = arith.addf %33, %35 : vector<16x8xf32>
    %37 = arith.addf %2, %36 : vector<16x8xf32>
    %cst_18 = arith.constant dense<0.000000e+00> : vector<16xf32>
    %38 = vector.multi_reduction <add>, %31, %cst_18 [1] : vector<16x24xf32> to vector<16xf32>
    %39 = vector.shape_cast %38 : vector<16xf32> to vector<16x1xf32>
    %cst_19 = arith.constant dense<0.000000e+00> : vector<16xf32>
    %40 = vector.multi_reduction <add>, %37, %cst_19 [1] : vector<16x8xf32> to vector<16xf32>
    %41 = vector.shape_cast %40 : vector<16xf32> to vector<16x1xf32>
    %42 = arith.addf %39, %41 : vector<16x1xf32>
    %cst_20 = arith.constant 3.125000e-02 : f32
    %43 = vector.broadcast %cst_20 : f32 to vector<16x1xf32>
    %44 = arith.mulf %42, %43 : vector<16x1xf32>
    %45 = vector.broadcast %44 : vector<16x1xf32> to vector<16x24xf32>
    %46 = arith.subf %31, %45 : vector<16x24xf32>
    %47 = vector.broadcast %44 : vector<16x1xf32> to vector<16x8xf32>
    %48 = arith.subf %37, %47 : vector<16x8xf32>
    %49 = arith.mulf %46, %46 : vector<16x24xf32>
    %cst_21 = arith.constant dense<0.000000e+00> : vector<16xf32>
    %50 = vector.multi_reduction <add>, %49, %cst_21 [1] : vector<16x24xf32> to vector<16xf32>
    %51 = vector.shape_cast %50 : vector<16xf32> to vector<16x1xf32>
    %52 = arith.mulf %48, %48 : vector<16x8xf32>
    %cst_22 = arith.constant dense<0.000000e+00> : vector<16xf32>
    %53 = vector.multi_reduction <add>, %52, %cst_22 [1] : vector<16x8xf32> to vector<16xf32>
    %54 = vector.shape_cast %53 : vector<16xf32> to vector<16x1xf32>
    %55 = arith.addf %51, %54 : vector<16x1xf32>
    %cst_23 = arith.constant 0.0322580636 : f32
    %56 = vector.broadcast %cst_23 : f32 to vector<16x1xf32>
    %57 = arith.mulf %55, %56 : vector<16x1xf32>
    %58 = math.sqrt %57 : vector<16x1xf32>
    %cst_24 = arith.constant 1.000000e-03 : f32
    %59 = vector.broadcast %cst_24 : f32 to vector<16x1xf32>
    %60 = arith.addf %58, %59 : vector<16x1xf32>
    %61 = tpu.reciprocal %60 {approx = true} : vector<16x1xf32> -> vector<16x1xf32>
    %62 = vector.broadcast %61 : vector<16x1xf32> to vector<16x24xf32>
    %63 = arith.mulf %46, %62 : vector<16x24xf32>
    %64 = vector.extract_strided_slice %6 {offsets = [0, 0], sizes = [1, 24], strides = [1, 1]} : vector<1x32xf32> to vector<1x24xf32>
    %65 = vector.broadcast %64 : vector<1x24xf32> to vector<16x24xf32>
    %66 = arith.mulf %63, %65 : vector<16x24xf32>
    %67 = vector.extract_strided_slice %7 {offsets = [0, 0], sizes = [1, 24], strides = [1, 1]} : vector<1x32xf32> to vector<1x24xf32>
    %68 = vector.broadcast %67 : vector<1x24xf32> to vector<16x24xf32>
    %69 = arith.addf %66, %68 : vector<16x24xf32>
    %c0_25 = arith.constant 0 : index
    %c0_26 = arith.constant 0 : index
    %70 = vector.load %arg8[%c0_25, %c0_26] : memref<16x32xf32, #tpu.memory_space<vmem>>, vector<16x24xf32>
    tpu.vector_store %arg8[%c0_25, %c0_26], %69 {strides = array<i32>} : memref<16x32xf32, #tpu.memory_space<vmem>>, vector<16x24xf32>,
    %71 = vector.broadcast %61 : vector<16x1xf32> to vector<16x8xf32>
    %72 = arith.mulf %48, %71 : vector<16x8xf32>
    %73 = vector.extract_strided_slice %6 {offsets = [0, 24], sizes = [1, 8], strides = [1, 1]} : vector<1x32xf32> to vector<1x8xf32>
    %74 = vector.broadcast %73 : vector<1x8xf32> to vector<16x8xf32>
    %75 = arith.mulf %72, %74 : vector<16x8xf32>
    %76 = vector.extract_strided_slice %7 {offsets = [0, 24], sizes = [1, 8], strides = [1, 1]} : vector<1x32xf32> to vector<1x8xf32>
    %77 = vector.broadcast %76 : vector<1x8xf32> to vector<16x8xf32>
    %78 = arith.addf %75, %77 : vector<16x8xf32>
    %c0_27 = arith.constant 0 : index
    %c24 = arith.constant 24 : index
    %79 = vector.load %arg8[%c0_27, %c24] : memref<16x32xf32, #tpu.memory_space<vmem>>, vector<16x8xf32>
    tpu.vector_store %arg8[%c0_27, %c24], %78 {strides = array<i32>} : memref<16x32xf32, #tpu.memory_space<vmem>>, vector<16x8xf32>,
    return
  }
  func.func @transform_0(%arg0: i32) -> (i32, i32) {
    %c0_i32 = arith.constant 0 : i32
    %c0_i32_0 = arith.constant 0 : i32
    return %arg0, %c0_i32 : i32, i32
  }
  func.func @transform_1(%arg0: i32) -> (i32, i32) {
    %c0_i32 = arith.constant 0 : i32
    %c0_i32_0 = arith.constant 0 : i32
    %c0_i32_1 = arith.constant 0 : i32
    return %c0_i32, %c0_i32_0 : i32, i32
  }
  func.func @transform_2(%arg0: i32) -> (i32, i32) {
    %c0_i32 = arith.constant 0 : i32
    %c0_i32_0 = arith.constant 0 : i32
    %c0_i32_1 = arith.constant 0 : i32
    return %c0_i32, %c0_i32_0 : i32, i32
  }
  func.func @transform_3(%arg0: i32) -> (i32, i32) {
    %c0_i32 = arith.constant 0 : i32
    %c0_i32_0 = arith.constant 0 : i32
    %c0_i32_1 = arith.constant 0 : i32
    return %c0_i32, %c0_i32_0 : i32, i32
  }
  func.func @transform_4(%arg0: i32) -> (i32, i32) {
    %c0_i32 = arith.constant 0 : i32
    %c0_i32_0 = arith.constant 0 : i32
    %c0_i32_1 = arith.constant 0 : i32
    return %c0_i32, %c0_i32_0 : i32, i32
  }
  func.func @transform_5(%arg0: i32) -> (i32, i32) {
    %c0_i32 = arith.constant 0 : i32
    %c0_i32_0 = arith.constant 0 : i32
    %c0_i32_1 = arith.constant 0 : i32
    return %c0_i32, %c0_i32_0 : i32, i32
  }
  func.func @transform_6(%arg0: i32) -> (i32, i32) {
    %c0_i32 = arith.constant 0 : i32
    %c0_i32_0 = arith.constant 0 : i32
    %c0_i32_1 = arith.constant 0 : i32
    return %c0_i32, %c0_i32_0 : i32, i32
  }
  func.func @transform_7(%arg0: i32) -> (i32, i32) {
    %c0_i32 = arith.constant 0 : i32
    %c0_i32_0 = arith.constant 0 : i32
    return %arg0, %c0_i32 : i32, i32
  }
}

module attributes {stable_mosaic.version = 11 : i64} {
  func.func @_ppff_kernel(%arg0: i32, %arg1: memref<16x32xf32, #tpu.memory_space<vmem>>, %arg2: memref<24x32xbf16, #tpu.memory_space<vmem>>, %arg3: memref<8x32xbf16, #tpu.memory_space<vmem>>, %arg4: memref<32x24xbf16, #tpu.memory_space<vmem>>, %arg5: memref<32x8xbf16, #tpu.memory_space<vmem>>, %arg6: memref<1x64xf32, #tpu.memory_space<vmem>>, %arg7: memref<3x32xf32, #tpu.memory_space<vmem>>, %arg8: memref<16x32xf32, #tpu.memory_space<vmem>>) attributes {dimension_semantics = [#tpu.dimension_semantics<parallel>], iteration_bounds = array<i64: 2>, scalar_prefetch = 0 : i64, scratch_operands = 0 : i64, tpu.core_type = #tpu.core_type<tc>, window_params = [{transform_indices = @transform_0, window_bounds = array<i64: 16, 32>}, {pipeline_mode = #tpu.pipeline_mode<synchronous>, transform_indices = @transform_1, window_bounds = array<i64: 24, 32>}, {pipeline_mode = #tpu.pipeline_mode<synchronous>, transform_indices = @transform_2, window_bounds = array<i64: 8, 32>}, {pipeline_mode = #tpu.pipeline_mode<synchronous>, transform_indices = @transform_3, window_bounds = array<i64: 32, 24>}, {pipeline_mode = #tpu.pipeline_mode<synchronous>, transform_indices = @transform_4, window_bounds = array<i64: 32, 8>}, {pipeline_mode = #tpu.pipeline_mode<synchronous>, transform_indices = @transform_5, window_bounds = array<i64: 1, 64>}, {pipeline_mode = #tpu.pipeline_mode<synchronous>, transform_indices = @transform_6, window_bounds = array<i64: 3, 32>}, {transform_indices = @transform_7, window_bounds = array<i64: 16, 32>}]} {
    %c0 = arith.constant 0 : index
    %c0_0 = arith.constant 0 : index
    %0 = vector.load %arg1[%c0, %c0_0] : memref<16x32xf32, #tpu.memory_space<vmem>>, vector<16x32xf32>
    %1 = vector.extract_strided_slice %0 {offsets = [0, 0], sizes = [16, 24], strides = [1, 1]} : vector<16x32xf32> to vector<16x24xf32>
    %2 = vector.extract_strided_slice %0 {offsets = [0, 24], sizes = [16, 8], strides = [1, 1]} : vector<16x32xf32> to vector<16x8xf32>
    %c0_1 = arith.constant 0 : index
    %c0_2 = arith.constant 0 : index
    %3 = vector.load %arg6[%c0_1, %c0_2] : memref<1x64xf32, #tpu.memory_space<vmem>>, vector<1x64xf32>
    %c0_3 = arith.constant 0 : index
    %c0_4 = arith.constant 0 : index
    %4 = vector.load %arg7[%c0_3, %c0_4] : memref<3x32xf32, #tpu.memory_space<vmem>>, vector<3x32xf32>
    %5 = vector.extract_strided_slice %4 {offsets = [0, 0], sizes = [1, 32], strides = [1, 1]} : vector<3x32xf32> to vector<1x32xf32>
    %6 = vector.extract_strided_slice %4 {offsets = [1, 0], sizes = [1, 32], strides = [1, 1]} : vector<3x32xf32> to vector<1x32xf32>
    %7 = vector.extract_strided_slice %4 {offsets = [2, 0], sizes = [1, 32], strides = [1, 1]} : vector<3x32xf32> to vector<1x32xf32>
    %8 = arith.truncf %1 : vector<16x24xf32> to vector<16x24xbf16>
    %c0_5 = arith.constant 0 : index
    %c0_6 = arith.constant 0 : index
    %9 = vector.load %arg2[%c0_5, %c0_6] : memref<24x32xbf16, #tpu.memory_space<vmem>>, vector<24x32xbf16>
    %cst = arith.constant dense<0.000000e+00> : vector<16x32xf32>
    %10 = tpu.matmul %8, %9, %cst {dimension_numbers = #tpu.dot_dimension_numbers<[1], [0], [0], [1], [0, 0, 1, 1], [], []>} : vector<16x24xbf16>, vector<24x32xbf16>, vector<16x32xf32> -> vector<16x32xf32>
    %11 = vector.extract_strided_slice %3 {offsets = [0, 0], sizes = [1, 32], strides = [1, 1]} : vector<1x64xf32> to vector<1x32xf32>
    %12 = vector.broadcast %11 : vector<1x32xf32> to vector<16x32xf32>
    %13 = arith.addf %10, %12 : vector<16x32xf32>
    %cst_7 = arith.constant 0.000000e+00 : f32
    %14 = vector.broadcast %cst_7 : f32 to vector<16x32xf32>
    %15 = arith.maximumf %13, %14 : vector<16x32xf32>
    %16 = arith.truncf %15 : vector<16x32xf32> to vector<16x32xbf16>
    %17 = arith.truncf %2 : vector<16x8xf32> to vector<16x8xbf16>
    %c0_8 = arith.constant 0 : index
    %c0_9 = arith.constant 0 : index
    %18 = vector.load %arg3[%c0_8, %c0_9] : memref<8x32xbf16, #tpu.memory_space<vmem>>, vector<8x32xbf16>
    %cst_10 = arith.constant dense<0.000000e+00> : vector<16x32xf32>
    %19 = tpu.matmul %17, %18, %cst_10 {dimension_numbers = #tpu.dot_dimension_numbers<[1], [0], [0], [1], [0, 0, 1, 1], [], []>} : vector<16x8xbf16>, vector<8x32xbf16>, vector<16x32xf32> -> vector<16x32xf32>
    %20 = vector.extract_strided_slice %3 {offsets = [0, 32], sizes = [1, 32], strides = [1, 1]} : vector<1x64xf32> to vector<1x32xf32>
    %21 = vector.broadcast %20 : vector<1x32xf32> to vector<16x32xf32>
    %22 = arith.addf %19, %21 : vector<16x32xf32>
    %cst_11 = arith.constant 0.000000e+00 : f32
    %23 = vector.broadcast %cst_11 : f32 to vector<16x32xf32>
    %24 = arith.maximumf %22, %23 : vector<16x32xf32>
    %25 = arith.truncf %24 : vector<16x32xf32> to vector<16x32xbf16>
    %c0_12 = arith.constant 0 : index
    %c0_13 = arith.constant 0 : index
    %26 = vector.load %arg4[%c0_12, %c0_13] : memref<32x24xbf16, #tpu.memory_space<vmem>>, vector<32x24xbf16>
    %cst_14 = arith.constant dense<0.000000e+00> : vector<16x24xf32>
    %27 = tpu.matmul %16, %26, %cst_14 {dimension_numbers = #tpu.dot_dimension_numbers<[1], [0], [0], [1], [0, 0, 1, 1], [], []>} : vector<16x32xbf16>, vector<32x24xbf16>, vector<16x24xf32> -> vector<16x24xf32>
    %28 = vector.extract_strided_slice %5 {offsets = [0, 0], sizes = [1, 24], strides = [1, 1]} : vector<1x32xf32> to vector<1x24xf32>
    %29 = vector.broadcast %28 : vector<1x24xf32> to vector<16x24xf32>
    %30 = arith.addf %27, %29 : vector<16x24xf32>
    %31 = arith.addf %1, %30 : vector<16x24xf32>
    %c0_15 = arith.constant 0 : index
    %c0_16 = arith.constant 0 : index
    %32 = vector.load %arg5[%c0_15, %c0_16] : memref<32x8xbf16, #tpu.memory_space<vmem>>, vector<32x8xbf16>
    %cst_17 = arith.constant dense<0.000000e+00> : vector<16x8xf32>
    %33 = tpu.matmul %25, %32, %cst_17 {dimension_numbers = #tpu.dot_dimension_numbers<[1], [0], [0], [1], [0, 0, 1, 1], [], []>} : vector<16x32xbf16>, vector<32x8xbf16>, vector<16x8xf32> -> vector<16x8xf32>
    %34 = vector.extract_strided_slice %5 {offsets = [0, 24], sizes = [1, 8], strides = [1, 1]} : vector<1x32xf32> to vector<1x8xf32>
    %35 = vector.broadcast %34 : vector<1x8xf32> to vector<16x8xf32>
    %36 = arith.addf %33, %35 : vector<16x8xf32>
    %37 = arith.addf %2, %36 : vector<16x8xf32>
    %cst_18 = arith.constant dense<0.000000e+00> : vector<16xf32>
    %38 = vector.multi_reduction <add>, %31, %cst_18 [1] : vector<16x24xf32> to vector<16xf32>
    %39 = vector.shape_cast %38 : vector<16xf32> to vector<16x1xf32>
    %cst_19 = arith.constant dense<0.000000e+00> : vector<16xf32>
    %40 = vector.multi_reduction <add>, %37, %cst_19 [1] : vector<16x8xf32> to vector<16xf32>
    %41 = vector.shape_cast %40 : vector<16xf32> to vector<16x1xf32>
    %42 = arith.addf %39, %41 : vector<16x1xf32>
    %cst_20 = arith.constant 3.125000e-02 : f32
    %43 = vector.broadcast %cst_20 : f32 to vector<16x1xf32>
    %44 = arith.mulf %42, %43 : vector<16x1xf32>
    %45 = vector.broadcast %44 : vector<16x1xf32> to vector<16x24xf32>
    %46 = arith.subf %31, %45 : vector<16x24xf32>
    %47 = vector.broadcast %44 : vector<16x1xf32> to vector<16x8xf32>
    %48 = arith.subf %37, %47 : vector<16x8xf32>
    %49 = arith.mulf %46, %46 : vector<16x24xf32>
    %cst_21 = arith.constant dense<0.000000e+00> : vector<16xf32>
    %50 = vector.multi_reduction <add>, %49, %cst_21 [1] : vector<16x24xf32> to vector<16xf32>
    %51 = vector.shape_cast %50 : vector<16xf32> to vector<16x1xf32>
    %52 = arith.mulf %48, %48 : vector<16x8xf32>
    %cst_22 = arith.constant dense<0.000000e+00> : vector<16xf32>
    %53 = vector.multi_reduction <add>, %52, %cst_22 [1] : vector<16x8xf32> to vector<16xf32>
    %54 = vector.shape_cast %53 : vector<16xf32> to vector<16x1xf32>
    %55 = arith.addf %51, %54 : vector<16x1xf32>
    %cst_23 = arith.constant 0.0322580636 : f32
    %56 = vector.broadcast %cst_23 : f32 to vector<16x1xf32>
    %57 = arith.mulf %55, %56 : vector<16x1xf32>
    %58 = math.sqrt %57 : vector<16x1xf32>
    %cst_24 = arith.constant 1.000000e-03 : f32
    %59 = vector.broadcast %cst_24 : f32 to vector<16x1xf32>
    %60 = arith.addf %58, %59 : vector<16x1xf32>
    %61 = tpu.reciprocal %60 {approx = true} : vector<16x1xf32> -> vector<16x1xf32>
    %62 = vector.broadcast %61 : vector<16x1xf32> to vector<16x24xf32>
    %63 = arith.mulf %46, %62 : vector<16x24xf32>
    %64 = vector.extract_strided_slice %6 {offsets = [0, 0], sizes = [1, 24], strides = [1, 1]} : vector<1x32xf32> to vector<1x24xf32>
    %65 = vector.broadcast %64 : vector<1x24xf32> to vector<16x24xf32>
    %66 = arith.mulf %63, %65 : vector<16x24xf32>
    %67 = vector.extract_strided_slice %7 {offsets = [0, 0], sizes = [1, 24], strides = [1, 1]} : vector<1x32xf32> to vector<1x24xf32>
    %68 = vector.broadcast %67 : vector<1x24xf32> to vector<16x24xf32>
    %69 = arith.addf %66, %68 : vector<16x24xf32>
    %c0_25 = arith.constant 0 : index
    %c0_26 = arith.constant 0 : index
    %70 = vector.load %arg8[%c0_25, %c0_26] : memref<16x32xf32, #tpu.memory_space<vmem>>, vector<16x24xf32>
    tpu.vector_store %arg8[%c0_25, %c0_26], %69 {strides = array<i32>} : memref<16x32xf32, #tpu.memory_space<vmem>>, vector<16x24xf32>,
    %71 = vector.broadcast %61 : vector<16x1xf32> to vector<16x8xf32>
    %72 = arith.mulf %48, %71 : vector<16x8xf32>
    %73 = vector.extract_strided_slice %6 {offsets = [0, 24], sizes = [1, 8], strides = [1, 1]} : vector<1x32xf32> to vector<1x8xf32>
    %74 = vector.broadcast %73 : vector<1x8xf32> to vector<16x8xf32>
    %75 = arith.mulf %72, %74 : vector<16x8xf32>
    %76 = vector.extract_strided_slice %7 {offsets = [0, 24], sizes = [1, 8], strides = [1, 1]} : vector<1x32xf32> to vector<1x8xf32>
    %77 = vector.broadcast %76 : vector<1x8xf32> to vector<16x8xf32>
    %78 = arith.addf %75, %77 : vector<16x8xf32>
    %c0_27 = arith.constant 0 : index
    %c24 = arith.constant 24 : index
    %79 = vector.load %arg8[%c0_27, %c24] : memref<16x32xf32, #tpu.memory_space<vmem>>, vector<16x8xf32>
    tpu.vector_store %arg8[%c0_27, %c24], %78 {strides = array<i32>} : memref<16x32xf32, #tpu.memory_space<vmem>>, vector<16x8xf32>,
    return
  }
  func.func @transform_0(%arg0: i32) -> (i32, i32) {
    %c0_i32 = arith.constant 0 : i32
    %c0_i32_0 = arith.constant 0 : i32
    return %arg0, %c0_i32 : i32, i32
  }
  func.func @transform_1(%arg0: i32) -> (i32, i32) {
    %c0_i32 = arith.constant 0 : i32
    %c0_i32_0 = arith.constant 0 : i32
    %c0_i32_1 = arith.constant 0 : i32
    return %c0_i32, %c0_i32_0 : i32, i32
  }
  func.func @transform_2(%arg0: i32) -> (i32, i32) {
    %c0_i32 = arith.constant 0 : i32
    %c0_i32_0 = arith.constant 0 : i32
    %c0_i32_1 = arith.constant 0 : i32
    return %c0_i32, %c0_i32_0 : i32, i32
  }
  func.func @transform_3(%arg0: i32) -> (i32, i32) {
    %c0_i32 = arith.constant 0 : i32
    %c0_i32_0 = arith.constant 0 : i32
    %c0_i32_1 = arith.constant 0 : i32
    return %c0_i32, %c0_i32_0 : i32, i32
  }
  func.func @transform_4(%arg0: i32) -> (i32, i32) {
    %c0_i32 = arith.constant 0 : i32
    %c0_i32_0 = arith.constant 0 : i32
    %c0_i32_1 = arith.constant 0 : i32
    return %c0_i32, %c0_i32_0 : i32, i32
  }
  func.func @transform_5(%arg0: i32) -> (i32, i32) {
    %c0_i32 = arith.constant 0 : i32
    %c0_i32_0 = arith.constant 0 : i32
    %c0_i32_1 = arith.constant 0 : i32
    return %c0_i32, %c0_i32_0 : i32, i32
  }
  func.func @transform_6(%arg0: i32) -> (i32, i32) {
    %c0_i32 = arith.constant 0 : i32
    %c0_i32_0 = arith.constant 0 : i32
    %c0_i32_1 = arith.constant 0 : i32
    return %c0_i32, %c0_i32_0 : i32, i32
  }
  func.func @transform_7(%arg0: i32) -> (i32, i32) {
    %c0_i32 = arith.constant 0 : i32
    %c0_i32_0 = arith.constant 0 : i32
    return %arg0, %c0_i32 : i32, i32
  }
}

</mosaic_0001>

<bundles_post_ra>
// kernel: tpu_custom_call.1
= control target key start
LH: loop header
LB: loop body
LE: loop exit
PB: predicated region body
PF: predicated region fallthrough
CT: control target
= control target key end

     0   :  { %12 = vsyncpa [#allocation3], 0  ;;  %s1067_s0 = inlined_call_operand.vmem [shape: f32[24,32], index: 0, kind: input, shape index: {}]   ;;  %s1068_s1 = inlined_call_operand.vmem [shape: bf16[24,32], index: 1, kind: input, shape index: {}]   ;;  %s1069_s2 = inlined_call_operand.vmem [shape: bf16[8,32], index: 2, kind: input, shape index: {}]   ;;  %s1070_s3 = inlined_call_operand.vmem [shape: bf16[32,24], index: 3, kind: input, shape index: {}]   ;;  %s1071_s4 = inlined_call_operand.vmem [shape: bf16[32,8], index: 4, kind: input, shape index: {}]   ;;  %s1072_s5 = inlined_call_operand.vmem [shape: f32[1,64], index: 5, kind: input, shape index: {}]   ;;  %s1073_s6 = inlined_call_operand.vmem [shape: f32[3,32], index: 6, kind: input, shape index: {}]   ;;  %s1074_s7 = inlined_call_operand.hbm [shape: f32[24,32], index: 7, kind: output, shape index: {}]  }
   0x1   :  { %14 = vsyncpa [#allocation3 + $0x1], 0  ;;  %s872_s24 = smov 0   ;;  %s874_s25 = smov 0  }
   0x2   :  { %s876_s26 = smov 0   ;;  %s878_s27 = smov 0  }
   0x3 LB: > { %s893_s28 = sadd.s32 4294967295, %s824_s27   ;;  %s653_s29 = sadd.s32 4294967294, %s824_s27   ;;  %s824_s27 = sphi %s878_s27, %s1083_s27   ;;  %s820_s26 = sphi %s876_s26, %s1082_s26   ;;  %s816_s25 = sphi %s874_s25, %s1081_s25   ;;  %s812_s24 = sphi %s872_s24, %s1080_s24  }
   0x4   : > { %s897_s30 = sadd.s32 1, %s824_s27   ;;  %s179_s8 = sadd.s32 1, %s820_s26 }
   0x5   : > { %s176_s9 = ssub.s32 %s824_s27, %s897_s30  ;;  %p189_p0 = scmp.ne.s32.totalorder %s820_s26, %s816_s25 }
   0x6   : > { %p177_p1 = scmp.eq.s32.totalorder %s176_s9, 0  ;;  %p190_p2 = scmp.eq.s32.totalorder %s893_s28, 1 }
   0x7   : > { %p195_p3 = scmp.ne.s32.totalorder %s816_s25, %s812_s24  ;;  %p196_p4 = scmp.eq.s32.totalorder %s653_s29, 1 }
   0x8   : > { %s908_s10 = scalar_select %p177_p1, %s820_s26, %s179_s8  }
   0x9   : > { %p910_p5 = por %p190_p2, %p189_p0  ;;  %p914_p6 = por %p196_p4, %p195_p3 }
   0xa   : > { %p656_p7 = scmp.ge.s32.totalorder %s824_s27, 1  ;;  %p249_p8 = scmp.lt.s32.totalorder %s824_s27, 3 }
   0xc   : > { %p250_p9 = pnand %p656_p7, %p249_p8 }
   0xd   : > { %s921_s13 = sshll.u32 (!%p250_p9), %s893_s28, 1  ;;  %s826_s21 = smov (!%p250_p9), 104  }
   0xe   : > { %253 = sbr.rel (%p250_p9) target bundleno = 1054 (0x41e), region = 48  ;;  %p290_p10 = scmp.lt.s32.totalorder (!%p250_p9), %s921_s13, 2 }
   0xf   : > { %s827_s29 = smov (!%p250_p9), 96   ;;  %s828_s14 = smov (!%p250_p9), 24  }
  0x10   : > { %s282_s15 = sand.u32 (!%p250_p9), 1, %s816_s25  }
  0x13   : > { %vm329_vm0 = vcmask 1043456   ;;  %v350_v0 = vld [vmem:[%s1069_s2] sm:$0xf]  ;;  %s291_s16 = scalar_select %p290_p10, %s921_s13, 2  ;;  %vm357_vm1 = vcmask 64512   ;;  %v697_v7 = vld [vmem:[%s1071_s4 + $0x8] sm:$0xff] }
  0x14   : > { %v362_v1 = vsel %vm329_vm0, %v350_v0, 0  ;;  %v742_v5 = vld [vmem:[%s1072_s5] ss:$0 sm:$0xff]  ;;  %447 = vmatpush.bf16.msra.mxu3 %v697_v7  ;;  %v312_v10 = vld [vmem:[%s1068_s1 + $0x8] sm:$0xf]  ;;  %vm325_vm2 = vcmask 195584  }
  0x15   : > { %371 = vmatpush.bf16.msra.mxu1 %v362_v1  ;;  %s659_s17 = sshll.u32 %s291_s16, 3  ;;  %v696_v8 = vld [vmem:[%s1071_s4] sm:$0xff]  ;;  %v321_v12 = vunpack.c.l.b16 %v312_v10  ;;  %vm398_vm3 = vcmask 261120   ;;  %v695_v25 = vld [vmem:[%s1070_s3 + $0x8] sm:$0xff]  ;;  %vm565_vm6 = vcmask 261312   ;;  %s577_s18 = ssub.s32 (%p910_p5), 3, %s921_s13 }
  0x16   : > { %s293_s20 = scalar_lea.vmem %s1067_s0, %s659_s17  ;;  %v952_v9 = vld [vmem:[%s1073_s6] sm:$0x7]  ;;  %408 = vmatpush.bf16.msra.mxu2 %v695_v25  ;;  %s1007_s17 = scalar_lea.sflag [#allocation3], %s282_s15 }
  0x17   : > { %v932_v2 = vld [vmem:[%s293_s20] sm:$0xff]  ;;  %v934_v3 = vld [vmem:[%s293_s20 + $0x8] sm:$0xff]  ;;  %v385_v11 = vperm.slane %v952_v9, 0  ;;  %v323_v13 = vpack.c.b16 %v321_v12, %v321_v12  ;;  %p578_p11 = scmp.lt.s32.totalorder (%p910_p5), %s577_s18, 2 }
  0x18   : > { %v309_v4 = vpack.c.bf16 %v934_v3, %v932_v2  ;;  %448 = vmatpush.bf16.msra.mxu3 %v696_v8  ;;  %v693_v15 = vld [vmem:[%s1068_s1] sm:$0xff] }
  0x19   : > { %435 = vrot.lane.b32.xlu1 %v385_v11, %s826_s21  ;;  %v331_v14 = vsel %vm329_vm0, %v323_v13, 0  ;;  %v694_v26 = vld [vmem:[%s1070_s3] sm:$0xff] }
  0x1a   : > { %352 = vrot.lane.b32.xlu0 %v309_v4, %s826_s21  ;;  %339 = vmatpush.bf16.msra.mxu0 %v331_v14 }
  0x1b   : > { %409 = vmatpush.bf16.msra.mxu2 %v694_v26 }
  0x1e   : > { %340 = vmatpush.bf16.msra.mxu0 %v693_v15 }
  0x21   : > { %664 = vmatmul.msk.bf16.vlgmr.msra.gmra.mxu0 %vm325_vm2, %v309_v4 }
  0x22   : > { %354 = vrot.lane.b32.xlu0 %v742_v5, %s827_s29 }
  0x8b   : > { %v436_v33 = vpop.permute.xlu1 %435 }
  0x8c   : > { %v353_v6 = vpop.permute.xlu0 %352 }
  0x8d   : > { %665 = vmatmul.msk.bf16.vlgmr.msra.gmra.mxu1 %vm357_vm1, %v353_v6 }
  0x94   : > { %v355_v17 = vpop.permute.xlu0 %354 }
  0x9e   : > { %v342_v24 = vpop.f32.mrf.mxu0 }
  0x9f   : > { %v343_v27 = vadd.f32 %v742_v5, %v342_v24 }
  0xa1   : > { %v347_v29 = vmax.f32 %v343_v27, 0.0 }
  0xa6   : > { %v344_v28 = vpop.f32.mrf.mxu0 }
  0xa7   : > { %v345_v30 = vadd.f32 %v742_v5, %v344_v28 }
  0xa9   : > { %v348_v31 = vmax.f32 %v345_v30, 0.0 }
  0xab   : > { %v349_v32 = vpack.c.bf16 %v348_v31, %v347_v29 }
  0xad   : > { %674 = vmatmul.msk.bf16.vlgmr.msra.gmra.mxu2 %vm398_vm3, %v349_v32 }
 0x10a   : > { %v373_v16 = vpop.f32.mrf.mxu1 }
 0x10b   : > { %v374_v18 = vadd.f32 %v373_v16, %v355_v17 }
 0x10d   : > { %v378_v21 = vmax.f32 %v374_v18, 0.0 }
 0x112   : > { %v375_v19 = vpop.f32.mrf.mxu1 }
 0x113   : > { %v376_v20 = vadd.f32 %v375_v19, %v355_v17 }
 0x115   : > { %v379_v22 = vmax.f32 %v376_v20, 0.0 }
 0x117   : > { %v380_v23 = vpack.c.bf16 %v379_v22, %v378_v21 }
 0x119   : > { %683 = vmatmul.msk.bf16.vlgmr.msra.gmra.mxu3 %vm398_vm3, %v380_v23 }
 0x130   : > { %v411_v42 = vpop.f32.mrf.mxu2 }
 0x131   : > { %v412_v43 = vadd.f32 %v411_v42, %v385_v11 }
 0x133   : > { %v416_v44 = vadd.f32 %v412_v43, %v932_v2 }
 0x135   : > { %v465_v45 = vsel %vm325_vm2, %v416_v44, 0.0 }
 0x138   : > { %v413_v46 = vpop.f32.mrf.mxu2 }
 0x139   : > { %v414_v47 = vadd.f32 %v413_v46, %v385_v11 }
 0x13b   : > { %v417_v48 = vadd.f32 %v414_v47, %v934_v3 }
 0x13d   : > { %v468_v49 = vsel %vm325_vm2, %v417_v48, 0.0 }
 0x19c   : > { %v450_v34 = vpop.f32.mrf.mxu3 }
 0x19d   : > { %v451_v35 = vadd.f32 %v450_v34, %v436_v33 }
 0x19f   : > { %457 = vrot.lane.b32.xlu1 %v451_v35, %s828_s14 }
 0x1a4   : > { %v452_v36 = vpop.f32.mrf.mxu3 }
 0x1a5   : > { %v453_v37 = vadd.f32 %v452_v36, %v436_v33  ;;  %v551_v36 = vperm.slane %v952_v9, 1 }
 0x1a7   : > { %459 = vrot.lane.b32.xlu2 %v453_v37, %s828_s14 }
 0x1c9   : > { %466 = vadd.xlane.f32.xlu1 %v465_v45 }
 0x201   : > { %v460_v38 = vpop.permute.xlu2 %459 }
 0x202   : > { %v464_v39 = vadd.f32 %v460_v38, %v934_v3 }
 0x204   : > { %475 = vrot.lane.b32.xlu0 %v464_v39, %s826_s21 }
 0x211   : > { %v458_v40 = vpop.permute.xlu1 %457 }
 0x212   : > { %v463_v41 = vadd.f32 %v458_v40, %v932_v2 }
 0x214   : > { %473 = vrot.lane.b32.xlu2 %v463_v41, %s826_s21 }
 0x23c   : > { %v467_v54 = vpop.xlane.xlu1 %466 }
 0x23d   : > { %469 = vadd.xlane.f32.xlu2 %v468_v49 }
 0x26e   : > { %v474_v50 = vpop.permute.xlu2 %473 }
 0x26f   : > { %v479_v51 = vsel %vm357_vm1, %v474_v50, 0.0 }
 0x270   : > { %480 = vadd.xlane.f32.xlu0 %v479_v51 }
 0x276   : > { %v476_v52 = vpop.permute.xlu0 %475 }
 0x277   : > { %v482_v53 = vsel %vm357_vm1, %v476_v52, 0.0 }
 0x278   : > { %483 = vadd.xlane.f32.xlu2 %v482_v53 }
 0x2b0   : > { %v470_v55 = vpop.xlane.xlu2 %469 }
 0x2e3   : > { %v481_v56 = vpop.xlane.xlu0 %480 }
 0x2e4   : > { %v485_v57 = vadd.f32 %v481_v56, %v467_v54 }
 0x2e6   : > { %v487_v58 = vmul.f32 0.03125, %v485_v57 }
 0x2e8   : > { %v980_v59 = vsub.f32 %v416_v44, %v487_v58  ;;  %v982_v60 = vsub.f32 %v463_v41, %v487_v58 }
 0x2ea   : > { %v501_v61 = vmul.f32 %v982_v60, %v982_v60  ;;  %v493_v62 = vmul.f32 %v980_v59, %v980_v59 }
 0x2eb   : > { %v484_v63 = vpop.xlane.xlu2 %483 }
 0x2ec   : > { %v486_v0 = vadd.f32 %v484_v63, %v470_v55  ;;  %505 = vrot.lane.b32.xlu1 %v501_v61, %s826_s21  ;;  %v495_v1 = vsel %vm325_vm2, %v493_v62, 0.0 }
 0x2ed   : > { %496 = vadd.xlane.f32.xlu0 %v495_v1 }
 0x2ee   : > { %v488_v2 = vmul.f32 0.03125, %v486_v0 }
 0x2f0   : > { %v490_v3 = vsub.f32 %v417_v48, %v488_v2  ;;  %v492_v4 = vsub.f32 %v464_v39, %v488_v2  ;;  %v554_v39 = vperm.slane %v952_v9, 2 }
 0x2f2   : > { %v502_v5 = vmul.f32 %v492_v4, %v492_v4  ;;  %v494_v6 = vmul.f32 %v490_v3, %v490_v3 }
 0x2f4   : > { %507 = vrot.lane.b32.xlu2 %v502_v5, %s826_s21  ;;  %v498_v7 = vsel %vm325_vm2, %v494_v6, 0.0  ;;  %s657_s21 = sshll.u32 %s282_s15, 4 }
 0x2f5   : > { %499 = vadd.xlane.f32.xlu0 %v498_v7  ;;  %s284_s16 = scalar_lea.vmem [#allocation2], %s657_s21 }
 0x34e   : > { %v508_v8 = vpop.permute.xlu2 %507 }
 0x34f   : > { %v514_v10 = vsel %vm357_vm1, %v508_v8, 0.0 }
 0x350   : > { %515 = vadd.xlane.f32.xlu1 %v514_v10 }
 0x35e   : > { %v506_v11 = vpop.permute.xlu1 %505 }
 0x35f   : > { %v511_v12 = vsel %vm357_vm1, %v506_v11, 0.0 }
 0x360   : > { %512 = vadd.xlane.f32.xlu0 %v511_v12  ;;  %v497_v13 = vpop.xlane.xlu0 %496 }
 0x368   : > { %v500_v14 = vpop.xlane.xlu0 %499 }
 0x3c3   : > { %v516_v15 = vpop.xlane.xlu1 %515 }
 0x3c4   : > { %v518_v16 = vadd.f32 %v516_v15, %v500_v14 }
 0x3c6   : > { %v520_v17 = vmul.f32 0.032258064, %v518_v16 }
 0x3c8   : > { %743 = vrsqrt.f32 %v520_v17  ;;  %vm540_vm4 = vcmp.eq.f32.partialorder %v520_v17, inf  ;;  %v543_v28 = vand.u32 2147483648, %v520_v17  ;;  %vm542_vm5 = vcmp.eq.f32.partialorder %v520_v17, 0.0 }
 0x3ce   : > { %v744_v18 = vpop.eup %743 }
 0x3cf   : > { %v534_v19 = vmul.f32 %v744_v18, %v520_v17 }
 0x3d1   : > { %v535_v20 = vmul.f32 %v744_v18, %v534_v19 }
 0x3d3   : > { %v536_v21 = vmul.f32 0.5, %v535_v20  ;;  %v513_v22 = vpop.xlane.xlu0 %512 }
 0x3d4   : > { %v517_v23 = vadd.f32 %v513_v22, %v497_v13 }
 0x3d5   : > { %v537_v24 = vsub.f32 1.5, %v536_v21 }
 0x3d6   : > { %v519_v25 = vmul.f32 0.032258064, %v517_v23 }
 0x3d7   : > { %v538_v26 = vmul.f32 %v744_v18, %v537_v24 }
 0x3d8   : > { %745 = vrsqrt.f32 %v519_v25  ;;  %vm528_vm7 = vcmp.eq.f32.partialorder %v519_v25, inf  ;;  %v531_v48 = vand.u32 2147483648, %v519_v25  ;;  %vm530_vm8 = vcmp.eq.f32.partialorder %v519_v25, 0.0 }
 0x3d9   : > { %v539_v27 = vmul.f32 %v538_v26, %v520_v17 }
 0x3db   : > { %v541_v29 = vsel %vm540_vm4, %v520_v17, %v539_v27 }
 0x3dc   : > { %v544_v30 = vsel %vm542_vm5, %v543_v28, %v541_v29 }
 0x3dd   : > { %v546_v31 = vadd.f32 0.001, %v544_v30 }
 0x3de   : > { %v746_v32 = vpop.eup %745 }
 0x3df   : > { %747 = vrcp.f32 %v546_v31  ;;  %v522_v33 = vmul.f32 %v746_v32, %v519_v25 }
 0x3e1   : > { %v523_v34 = vmul.f32 %v746_v32, %v522_v33 }
 0x3e3   : > { %v524_v35 = vmul.f32 0.5, %v523_v34 }
 0x3e5   : > { %v748_v37 = vpop.eup %747  ;;  %v525_v38 = vsub.f32 1.5, %v524_v35 }
 0x3e6   : > { %v550_v40 = vmul.f32 %v748_v37, %v490_v3  ;;  %v560_v41 = vmul.f32 %v748_v37, %v492_v4 }
 0x3e7   : > { %v526_v42 = vmul.f32 %v746_v32, %v525_v38 }
 0x3e8   : > { %v553_v43 = vmul.f32 %v551_v36, %v550_v40  ;;  %v562_v44 = vmul.f32 %v560_v41, %v551_v36 }
 0x3e9   : > { %v527_v45 = vmul.f32 %v526_v42, %v519_v25 }
 0x3ea   : > { %v556_v46 = vadd.f32 %v554_v39, %v553_v43  ;;  %v564_v47 = vadd.f32 %v562_v44, %v554_v39 }
 0x3eb   : > { %v529_v49 = vsel %vm528_vm7, %v519_v25, %v527_v45 }
 0x3ec   : > { %558 = vst.msk [vmem:[%s284_s16 + $0x8] sm:$0xff] %vm325_vm2, %v556_v46  ;;  %v532_v9 = vsel %vm530_vm8, %v531_v48, %v529_v49 }
 0x3ed   : > { %567 = vst.msk [vmem:[%s284_s16 + $0x8] sm:$0xff] %vm565_vm6, %v564_v47  ;;  %v545_v50 = vadd.f32 0.001, %v532_v9 }
 0x3ef   : > { %749 = vrcp.f32 %v545_v50 }
 0x3f5   : > { %v750_v51 = vpop.eup %749 }
 0x3f6   : > { %v549_v52 = vmul.f32 %v750_v51, %v980_v59  ;;  %v559_v53 = vmul.f32 %v750_v51, %v982_v60 }
 0x3f8   : > { %v552_v54 = vmul.f32 %v551_v36, %v549_v52  ;;  %v561_v55 = vmul.f32 %v559_v53, %v551_v36 }
 0x3f9   : > { %575 = sbr.rel (!%p910_p5) target bundleno = 1054 (0x41e), region = 52 }
 0x3fa   : > { %v555_v56 = vadd.f32 %v554_v39, %v552_v54  ;;  %v563_v57 = vadd.f32 %v561_v55, %v554_v39 }
 0x3fc   : > { %557 = vst.msk [vmem:[%s284_s16] sm:$0xff] %vm325_vm2, %v555_v56 }
 0x3fd   : > { %566 = vst.msk [vmem:[%s284_s16] sm:$0xff] %vm565_vm6, %v563_v57 }
 0x3fe   : > { %s1085_s18 = smov (!%p578_p11, %s577_s18), 2 }
 0x3ff   : > { %s686_s19 = sshll.u32 %s1085_s18, 3 }
 0x400   : > { %s581_s20 = ssub.s32 16, %s686_s19 }
 0x401   : > { %s582_s22 = sshll.u32 %s581_s20, 4 }
 0x402   : > { %583 = vsyncadd %s1007_s17, %s582_s22  ;;  %p1016_p12 = scmp.ne.s32.totalorder %s686_s19, 0  ;;  %s698_s11 = sshll.u32 %s893_s28, 4 }
 0x403   : > { %s586_s13 = scalar_lea.hbm %s1074_s7, %s698_s11  ;;  %s588_s9 = sshll.u32 %s284_s16, 4  ;;  %s1024_s9 = int_to_ptr.vmem [resolvable:$true] %s588_s9 }
 0x404   : > { %s590_s14 = sshll.u32 %s586_s13, 4  ;;  %s1075_s15 = sshll.u32 %s1085_s18, 7  ;;  %s1026_s14 = int_to_ptr.hbm [resolvable:$true] %s590_s14 }
 0x405   : > { %s751_s21 = sshra.s32 %s1024_s9, 4  ;;  %s753_s19 = sshrl.u32 %s1075_s15, 4  ;;  %s752_s21 = int_to_ptr.vmem [resolvable:$true] %s751_s21 }
 0x406   : > { %s758_s20 = scalar_lea.vmem %s752_s21, %s753_s19  ;;  %s829_s28 = smov [#allocation2]  }
 0x407   : > { %p759_p13 = scmp.ne.s32.totalorder %s752_s21, %s758_s20  ;;  %s762_s22 = scalar_lea.vmem %s829_s28, 32 }
 0x408   : > { %p764_p2 = scmp.lt.s32.totalorder %s762_s22, %s758_s20 }
 0x409   : > { %p760_p0 = pnand %p759_p13, %p1016_p12 }
 0x40b   : > { %p761_p1 = pneg %p760_p0 }
 0x40d   : > { %p766_p3 = pnand %p764_p2, %p761_p1 }
 0x40f   : > { %769 = shalt.err (!%p766_p3)
}
 0x410   : > { %s770_s16 = sshra.s32 %s1026_s14, 4  ;;  %s781_s13 = scalar_lea.hbm %s1074_s7, 24  ;;  %s771_s16 = int_to_ptr.hbm [resolvable:$true] %s770_s16 }
 0x411   : > { %s777_s11 = scalar_lea.hbm %s771_s16, %s753_s19  ;;  %p782_p8 = scmp.lt.s32.totalorder %s771_s16, %s1074_s7 }
 0x412   : > { %p778_p4 = scmp.ne.s32.totalorder %s771_s16, %s777_s11  ;;  %p783_p9 = scmp.lt.s32.totalorder %s781_s13, %s777_s11 }
 0x414   : > { %p779_p5 = pnand %p778_p4, %p1016_p12  ;;  %p784_p10 = por %p783_p9, %p782_p8 }
 0x416   : > { %p780_p7 = pneg %p779_p5 }
 0x418   : > { %p785_p11 = pnand %p784_p10, %p780_p7 }
 0x41a   : > { %788 = shalt.err (!%p785_p11)
}
 0x41b   : > { %s830_s20 = smov 128   ;;  %s831_s19 = smov 8  }
 0x41c   : > { %s1079_s28 = sshll.u32 %s1085_s18, 7 }
 0x41d   : > { %596 = dma.vmem_to_hbm [thread:$0]  (%p1016_p12), %s1024_s9, %s1079_s28, %s1026_s14, %s1007_s17, %s830_s20, %s830_s20, %s831_s19  }
 0x41e PF: > { %p704_p13 = scmp.ge.s32.totalorder %s824_s27, 2  ;;  %s605_s15 = sand.u32 1, %s812_s24  }
 0x41f   : > { %s606_s22 = scalar_lea.sflag [#allocation3], %s605_s15 }
 0x420   : > { %p701_p0 = pnand %p704_p13, %p914_p6 }
 0x422   : > { %p702_p1 = pneg %p701_p0 }
 0x424   : > { %807 = dma.done.wait (%p702_p1), %s606_s22, 256  }
 0x425   : > { %809 = vsyncadd (%p702_p1), %s606_s22, 4294967040  ;;  %p17_p2 = scmp.ge.s32.totalorder %s897_s30, 4   ;;  %s1080_s24 = smov %s816_s25 }
 0x426   : > { %s1081_s25 = smov %s820_s26  ;;  %s1082_s26 = smov %s908_s10 }
 0x427   : > { %s1083_s27 = smov %s897_s30  ;;  %19 = sbr.rel (!%p17_p2) target bundleno = 3 (0x3), region = 83 }
 0x42c   :  { %612 = vsyncpa [#allocation3], 1 }
 0x42d   :  { %614 = vsyncpa [#allocation3 + $0x1], 1 }

// kernel: tpu_custom_call.1
= control target key start
LH: loop header
LB: loop body
LE: loop exit
PB: predicated region body
PF: predicated region fallthrough
CT: control target
= control target key end

     0   :  { %12 = vsyncpa [#allocation3], 0  ;;  %s1067_s0 = inlined_call_operand.vmem [shape: f32[24,32], index: 0, kind: input, shape index: {}]   ;;  %s1068_s1 = inlined_call_operand.vmem [shape: bf16[24,32], index: 1, kind: input, shape index: {}]   ;;  %s1069_s2 = inlined_call_operand.vmem [shape: bf16[8,32], index: 2, kind: input, shape index: {}]   ;;  %s1070_s3 = inlined_call_operand.vmem [shape: bf16[32,24], index: 3, kind: input, shape index: {}]   ;;  %s1071_s4 = inlined_call_operand.vmem [shape: bf16[32,8], index: 4, kind: input, shape index: {}]   ;;  %s1072_s5 = inlined_call_operand.vmem [shape: f32[1,64], index: 5, kind: input, shape index: {}]   ;;  %s1073_s6 = inlined_call_operand.vmem [shape: f32[3,32], index: 6, kind: input, shape index: {}]   ;;  %s1074_s7 = inlined_call_operand.hbm [shape: f32[24,32], index: 7, kind: output, shape index: {}]  }
   0x1   :  { %14 = vsyncpa [#allocation3 + $0x1], 0  ;;  %s872_s24 = smov 0   ;;  %s874_s25 = smov 0  }
   0x2   :  { %s876_s26 = smov 0   ;;  %s878_s27 = smov 0  }
   0x3 LB: > { %s893_s28 = sadd.s32 4294967295, %s824_s27   ;;  %s653_s29 = sadd.s32 4294967294, %s824_s27   ;;  %s824_s27 = sphi %s878_s27, %s1083_s27   ;;  %s820_s26 = sphi %s876_s26, %s1082_s26   ;;  %s816_s25 = sphi %s874_s25, %s1081_s25   ;;  %s812_s24 = sphi %s872_s24, %s1080_s24  }
   0x4   : > { %s897_s30 = sadd.s32 1, %s824_s27   ;;  %s179_s8 = sadd.s32 1, %s820_s26 }
   0x5   : > { %s176_s9 = ssub.s32 %s824_s27, %s897_s30  ;;  %p189_p0 = scmp.ne.s32.totalorder %s820_s26, %s816_s25 }
   0x6   : > { %p177_p1 = scmp.eq.s32.totalorder %s176_s9, 0  ;;  %p190_p2 = scmp.eq.s32.totalorder %s893_s28, 1 }
   0x7   : > { %p195_p3 = scmp.ne.s32.totalorder %s816_s25, %s812_s24  ;;  %p196_p4 = scmp.eq.s32.totalorder %s653_s29, 1 }
   0x8   : > { %s908_s10 = scalar_select %p177_p1, %s820_s26, %s179_s8  }
   0x9   : > { %p910_p5 = por %p190_p2, %p189_p0  ;;  %p914_p6 = por %p196_p4, %p195_p3 }
   0xa   : > { %p656_p7 = scmp.ge.s32.totalorder %s824_s27, 1  ;;  %p249_p8 = scmp.lt.s32.totalorder %s824_s27, 3 }
   0xc   : > { %p250_p9 = pnand %p656_p7, %p249_p8 }
   0xd   : > { %s921_s13 = sshll.u32 (!%p250_p9), %s893_s28, 1  ;;  %s826_s21 = smov (!%p250_p9), 104  }
   0xe   : > { %253 = sbr.rel (%p250_p9) target bundleno = 1054 (0x41e), region = 48  ;;  %p290_p10 = scmp.lt.s32.totalorder (!%p250_p9), %s921_s13, 2 }
   0xf   : > { %s827_s29 = smov (!%p250_p9), 96   ;;  %s828_s14 = smov (!%p250_p9), 24  }
  0x10   : > { %s282_s15 = sand.u32 (!%p250_p9), 1, %s816_s25  }
  0x13   : > { %vm329_vm0 = vcmask 1043456   ;;  %v350_v0 = vld [vmem:[%s1069_s2] sm:$0xf]  ;;  %s291_s16 = scalar_select %p290_p10, %s921_s13, 2  ;;  %vm357_vm1 = vcmask 64512   ;;  %v697_v7 = vld [vmem:[%s1071_s4 + $0x8] sm:$0xff] }
  0x14   : > { %v362_v1 = vsel %vm329_vm0, %v350_v0, 0  ;;  %v742_v5 = vld [vmem:[%s1072_s5] ss:$0 sm:$0xff]  ;;  %447 = vmatpush.bf16.msra.mxu3 %v697_v7  ;;  %v312_v10 = vld [vmem:[%s1068_s1 + $0x8] sm:$0xf]  ;;  %vm325_vm2 = vcmask 195584  }
  0x15   : > { %371 = vmatpush.bf16.msra.mxu1 %v362_v1  ;;  %s659_s17 = sshll.u32 %s291_s16, 3  ;;  %v696_v8 = vld [vmem:[%s1071_s4] sm:$0xff]  ;;  %v321_v12 = vunpack.c.l.b16 %v312_v10  ;;  %vm398_vm3 = vcmask 261120   ;;  %v695_v25 = vld [vmem:[%s1070_s3 + $0x8] sm:$0xff]  ;;  %vm565_vm6 = vcmask 261312   ;;  %s577_s18 = ssub.s32 (%p910_p5), 3, %s921_s13 }
  0x16   : > { %s293_s20 = scalar_lea.vmem %s1067_s0, %s659_s17  ;;  %v952_v9 = vld [vmem:[%s1073_s6] sm:$0x7]  ;;  %408 = vmatpush.bf16.msra.mxu2 %v695_v25  ;;  %s1007_s17 = scalar_lea.sflag [#allocation3], %s282_s15 }
  0x17   : > { %v932_v2 = vld [vmem:[%s293_s20] sm:$0xff]  ;;  %v934_v3 = vld [vmem:[%s293_s20 + $0x8] sm:$0xff]  ;;  %v385_v11 = vperm.slane %v952_v9, 0  ;;  %v323_v13 = vpack.c.b16 %v321_v12, %v321_v12  ;;  %p578_p11 = scmp.lt.s32.totalorder (%p910_p5), %s577_s18, 2 }
  0x18   : > { %v309_v4 = vpack.c.bf16 %v934_v3, %v932_v2  ;;  %448 = vmatpush.bf16.msra.mxu3 %v696_v8  ;;  %v693_v15 = vld [vmem:[%s1068_s1] sm:$0xff] }
  0x19   : > { %435 = vrot.lane.b32.xlu1 %v385_v11, %s826_s21  ;;  %v331_v14 = vsel %vm329_vm0, %v323_v13, 0  ;;  %v694_v26 = vld [vmem:[%s1070_s3] sm:$0xff] }
  0x1a   : > { %352 = vrot.lane.b32.xlu0 %v309_v4, %s826_s21  ;;  %339 = vmatpush.bf16.msra.mxu0 %v331_v14 }
  0x1b   : > { %409 = vmatpush.bf16.msra.mxu2 %v694_v26 }
  0x1e   : > { %340 = vmatpush.bf16.msra.mxu0 %v693_v15 }
  0x21   : > { %664 = vmatmul.msk.bf16.vlgmr.msra.gmra.mxu0 %vm325_vm2, %v309_v4 }
  0x22   : > { %354 = vrot.lane.b32.xlu0 %v742_v5, %s827_s29 }
  0x8b   : > { %v436_v33 = vpop.permute.xlu1 %435 }
  0x8c   : > { %v353_v6 = vpop.permute.xlu0 %352 }
  0x8d   : > { %665 = vmatmul.msk.bf16.vlgmr.msra.gmra.mxu1 %vm357_vm1, %v353_v6 }
  0x94   : > { %v355_v17 = vpop.permute.xlu0 %354 }
  0x9e   : > { %v342_v24 = vpop.f32.mrf.mxu0 }
  0x9f   : > { %v343_v27 = vadd.f32 %v742_v5, %v342_v24 }
  0xa1   : > { %v347_v29 = vmax.f32 %v343_v27, 0.0 }
  0xa6   : > { %v344_v28 = vpop.f32.mrf.mxu0 }
  0xa7   : > { %v345_v30 = vadd.f32 %v742_v5, %v344_v28 }
  0xa9   : > { %v348_v31 = vmax.f32 %v345_v30, 0.0 }
  0xab   : > { %v349_v32 = vpack.c.bf16 %v348_v31, %v347_v29 }
  0xad   : > { %674 = vmatmul.msk.bf16.vlgmr.msra.gmra.mxu2 %vm398_vm3, %v349_v32 }
 0x10a   : > { %v373_v16 = vpop.f32.mrf.mxu1 }
 0x10b   : > { %v374_v18 = vadd.f32 %v373_v16, %v355_v17 }
 0x10d   : > { %v378_v21 = vmax.f32 %v374_v18, 0.0 }
 0x112   : > { %v375_v19 = vpop.f32.mrf.mxu1 }
 0x113   : > { %v376_v20 = vadd.f32 %v375_v19, %v355_v17 }
 0x115   : > { %v379_v22 = vmax.f32 %v376_v20, 0.0 }
 0x117   : > { %v380_v23 = vpack.c.bf16 %v379_v22, %v378_v21 }
 0x119   : > { %683 = vmatmul.msk.bf16.vlgmr.msra.gmra.mxu3 %vm398_vm3, %v380_v23 }
 0x130   : > { %v411_v42 = vpop.f32.mrf.mxu2 }
 0x131   : > { %v412_v43 = vadd.f32 %v411_v42, %v385_v11 }
 0x133   : > { %v416_v44 = vadd.f32 %v412_v43, %v932_v2 }
 0x135   : > { %v465_v45 = vsel %vm325_vm2, %v416_v44, 0.0 }
 0x138   : > { %v413_v46 = vpop.f32.mrf.mxu2 }
 0x139   : > { %v414_v47 = vadd.f32 %v413_v46, %v385_v11 }
 0x13b   : > { %v417_v48 = vadd.f32 %v414_v47, %v934_v3 }
 0x13d   : > { %v468_v49 = vsel %vm325_vm2, %v417_v48, 0.0 }
 0x19c   : > { %v450_v34 = vpop.f32.mrf.mxu3 }
 0x19d   : > { %v451_v35 = vadd.f32 %v450_v34, %v436_v33 }
 0x19f   : > { %457 = vrot.lane.b32.xlu1 %v451_v35, %s828_s14 }
 0x1a4   : > { %v452_v36 = vpop.f32.mrf.mxu3 }
 0x1a5   : > { %v453_v37 = vadd.f32 %v452_v36, %v436_v33  ;;  %v551_v36 = vperm.slane %v952_v9, 1 }
 0x1a7   : > { %459 = vrot.lane.b32.xlu2 %v453_v37, %s828_s14 }
 0x1c9   : > { %466 = vadd.xlane.f32.xlu1 %v465_v45 }
 0x201   : > { %v460_v38 = vpop.permute.xlu2 %459 }
 0x202   : > { %v464_v39 = vadd.f32 %v460_v38, %v934_v3 }
 0x204   : > { %475 = vrot.lane.b32.xlu0 %v464_v39, %s826_s21 }
 0x211   : > { %v458_v40 = vpop.permute.xlu1 %457 }
 0x212   : > { %v463_v41 = vadd.f32 %v458_v40, %v932_v2 }
 0x214   : > { %473 = vrot.lane.b32.xlu2 %v463_v41, %s826_s21 }
 0x23c   : > { %v467_v54 = vpop.xlane.xlu1 %466 }
 0x23d   : > { %469 = vadd.xlane.f32.xlu2 %v468_v49 }
 0x26e   : > { %v474_v50 = vpop.permute.xlu2 %473 }
 0x26f   : > { %v479_v51 = vsel %vm357_vm1, %v474_v50, 0.0 }
 0x270   : > { %480 = vadd.xlane.f32.xlu0 %v479_v51 }
 0x276   : > { %v476_v52 = vpop.permute.xlu0 %475 }
 0x277   : > { %v482_v53 = vsel %vm357_vm1, %v476_v52, 0.0 }
 0x278   : > { %483 = vadd.xlane.f32.xlu2 %v482_v53 }
 0x2b0   : > { %v470_v55 = vpop.xlane.xlu2 %469 }
 0x2e3   : > { %v481_v56 = vpop.xlane.xlu0 %480 }
 0x2e4   : > { %v485_v57 = vadd.f32 %v481_v56, %v467_v54 }
 0x2e6   : > { %v487_v58 = vmul.f32 0.03125, %v485_v57 }
 0x2e8   : > { %v980_v59 = vsub.f32 %v416_v44, %v487_v58  ;;  %v982_v60 = vsub.f32 %v463_v41, %v487_v58 }
 0x2ea   : > { %v501_v61 = vmul.f32 %v982_v60, %v982_v60  ;;  %v493_v62 = vmul.f32 %v980_v59, %v980_v59 }
 0x2eb   : > { %v484_v63 = vpop.xlane.xlu2 %483 }
 0x2ec   : > { %v486_v0 = vadd.f32 %v484_v63, %v470_v55  ;;  %505 = vrot.lane.b32.xlu1 %v501_v61, %s826_s21  ;;  %v495_v1 = vsel %vm325_vm2, %v493_v62, 0.0 }
 0x2ed   : > { %496 = vadd.xlane.f32.xlu0 %v495_v1 }
 0x2ee   : > { %v488_v2 = vmul.f32 0.03125, %v486_v0 }
 0x2f0   : > { %v490_v3 = vsub.f32 %v417_v48, %v488_v2  ;;  %v492_v4 = vsub.f32 %v464_v39, %v488_v2  ;;  %v554_v39 = vperm.slane %v952_v9, 2 }
 0x2f2   : > { %v502_v5 = vmul.f32 %v492_v4, %v492_v4  ;;  %v494_v6 = vmul.f32 %v490_v3, %v490_v3 }
 0x2f4   : > { %507 = vrot.lane.b32.xlu2 %v502_v5, %s826_s21  ;;  %v498_v7 = vsel %vm325_vm2, %v494_v6, 0.0  ;;  %s657_s21 = sshll.u32 %s282_s15, 4 }
 0x2f5   : > { %499 = vadd.xlane.f32.xlu0 %v498_v7  ;;  %s284_s16 = scalar_lea.vmem [#allocation2], %s657_s21 }
 0x34e   : > { %v508_v8 = vpop.permute.xlu2 %507 }
 0x34f   : > { %v514_v10 = vsel %vm357_vm1, %v508_v8, 0.0 }
 0x350   : > { %515 = vadd.xlane.f32.xlu1 %v514_v10 }
 0x35e   : > { %v506_v11 = vpop.permute.xlu1 %505 }
 0x35f   : > { %v511_v12 = vsel %vm357_vm1, %v506_v11, 0.0 }
 0x360   : > { %512 = vadd.xlane.f32.xlu0 %v511_v12  ;;  %v497_v13 = vpop.xlane.xlu0 %496 }
 0x368   : > { %v500_v14 = vpop.xlane.xlu0 %499 }
 0x3c3   : > { %v516_v15 = vpop.xlane.xlu1 %515 }
 0x3c4   : > { %v518_v16 = vadd.f32 %v516_v15, %v500_v14 }
 0x3c6   : > { %v520_v17 = vmul.f32 0.032258064, %v518_v16 }
 0x3c8   : > { %743 = vrsqrt.f32 %v520_v17  ;;  %vm540_vm4 = vcmp.eq.f32.partialorder %v520_v17, inf  ;;  %v543_v28 = vand.u32 2147483648, %v520_v17  ;;  %vm542_vm5 = vcmp.eq.f32.partialorder %v520_v17, 0.0 }
 0x3ce   : > { %v744_v18 = vpop.eup %743 }
 0x3cf   : > { %v534_v19 = vmul.f32 %v744_v18, %v520_v17 }
 0x3d1   : > { %v535_v20 = vmul.f32 %v744_v18, %v534_v19 }
 0x3d3   : > { %v536_v21 = vmul.f32 0.5, %v535_v20  ;;  %v513_v22 = vpop.xlane.xlu0 %512 }
 0x3d4   : > { %v517_v23 = vadd.f32 %v513_v22, %v497_v13 }
 0x3d5   : > { %v537_v24 = vsub.f32 1.5, %v536_v21 }
 0x3d6   : > { %v519_v25 = vmul.f32 0.032258064, %v517_v23 }
 0x3d7   : > { %v538_v26 = vmul.f32 %v744_v18, %v537_v24 }
 0x3d8   : > { %745 = vrsqrt.f32 %v519_v25  ;;  %vm528_vm7 = vcmp.eq.f32.partialorder %v519_v25, inf  ;;  %v531_v48 = vand.u32 2147483648, %v519_v25  ;;  %vm530_vm8 = vcmp.eq.f32.partialorder %v519_v25, 0.0 }
 0x3d9   : > { %v539_v27 = vmul.f32 %v538_v26, %v520_v17 }
 0x3db   : > { %v541_v29 = vsel %vm540_vm4, %v520_v17, %v539_v27 }
 0x3dc   : > { %v544_v30 = vsel %vm542_vm5, %v543_v28, %v541_v29 }
 0x3dd   : > { %v546_v31 = vadd.f32 0.001, %v544_v30 }
 0x3de   : > { %v746_v32 = vpop.eup %745 }
 0x3df   : > { %747 = vrcp.f32 %v546_v31  ;;  %v522_v33 = vmul.f32 %v746_v32, %v519_v25 }
 0x3e1   : > { %v523_v34 = vmul.f32 %v746_v32, %v522_v33 }
 0x3e3   : > { %v524_v35 = vmul.f32 0.5, %v523_v34 }
 0x3e5   : > { %v748_v37 = vpop.eup %747  ;;  %v525_v38 = vsub.f32 1.5, %v524_v35 }
 0x3e6   : > { %v550_v40 = vmul.f32 %v748_v37, %v490_v3  ;;  %v560_v41 = vmul.f32 %v748_v37, %v492_v4 }
 0x3e7   : > { %v526_v42 = vmul.f32 %v746_v32, %v525_v38 }
 0x3e8   : > { %v553_v43 = vmul.f32 %v551_v36, %v550_v40  ;;  %v562_v44 = vmul.f32 %v560_v41, %v551_v36 }
 0x3e9   : > { %v527_v45 = vmul.f32 %v526_v42, %v519_v25 }
 0x3ea   : > { %v556_v46 = vadd.f32 %v554_v39, %v553_v43  ;;  %v564_v47 = vadd.f32 %v562_v44, %v554_v39 }
 0x3eb   : > { %v529_v49 = vsel %vm528_vm7, %v519_v25, %v527_v45 }
 0x3ec   : > { %558 = vst.msk [vmem:[%s284_s16 + $0x8] sm:$0xff] %vm325_vm2, %v556_v46  ;;  %v532_v9 = vsel %vm530_vm8, %v531_v48, %v529_v49 }
 0x3ed   : > { %567 = vst.msk [vmem:[%s284_s16 + $0x8] sm:$0xff] %vm565_vm6, %v564_v47  ;;  %v545_v50 = vadd.f32 0.001, %v532_v9 }
 0x3ef   : > { %749 = vrcp.f32 %v545_v50 }
 0x3f5   : > { %v750_v51 = vpop.eup %749 }
 0x3f6   : > { %v549_v52 = vmul.f32 %v750_v51, %v980_v59  ;;  %v559_v53 = vmul.f32 %v750_v51, %v982_v60 }
 0x3f8   : > { %v552_v54 = vmul.f32 %v551_v36, %v549_v52  ;;  %v561_v55 = vmul.f32 %v559_v53, %v551_v36 }
 0x3f9   : > { %575 = sbr.rel (!%p910_p5) target bundleno = 1054 (0x41e), region = 52 }
 0x3fa   : > { %v555_v56 = vadd.f32 %v554_v39, %v552_v54  ;;  %v563_v57 = vadd.f32 %v561_v55, %v554_v39 }
 0x3fc   : > { %557 = vst.msk [vmem:[%s284_s16] sm:$0xff] %vm325_vm2, %v555_v56 }
 0x3fd   : > { %566 = vst.msk [vmem:[%s284_s16] sm:$0xff] %vm565_vm6, %v563_v57 }
 0x3fe   : > { %s1085_s18 = smov (!%p578_p11, %s577_s18), 2 }
 0x3ff   : > { %s686_s19 = sshll.u32 %s1085_s18, 3 }
 0x400   : > { %s581_s20 = ssub.s32 16, %s686_s19 }
 0x401   : > { %s582_s22 = sshll.u32 %s581_s20, 4 }
 0x402   : > { %583 = vsyncadd %s1007_s17, %s582_s22  ;;  %p1016_p12 = scmp.ne.s32.totalorder %s686_s19, 0  ;;  %s698_s11 = sshll.u32 %s893_s28, 4 }
 0x403   : > { %s586_s13 = scalar_lea.hbm %s1074_s7, %s698_s11  ;;  %s588_s9 = sshll.u32 %s284_s16, 4  ;;  %s1024_s9 = int_to_ptr.vmem [resolvable:$true] %s588_s9 }
 0x404   : > { %s590_s14 = sshll.u32 %s586_s13, 4  ;;  %s1075_s15 = sshll.u32 %s1085_s18, 7  ;;  %s1026_s14 = int_to_ptr.hbm [resolvable:$true] %s590_s14 }
 0x405   : > { %s751_s21 = sshra.s32 %s1024_s9, 4  ;;  %s753_s19 = sshrl.u32 %s1075_s15, 4  ;;  %s752_s21 = int_to_ptr.vmem [resolvable:$true] %s751_s21 }
 0x406   : > { %s758_s20 = scalar_lea.vmem %s752_s21, %s753_s19  ;;  %s829_s28 = smov [#allocation2]  }
 0x407   : > { %p759_p13 = scmp.ne.s32.totalorder %s752_s21, %s758_s20  ;;  %s762_s22 = scalar_lea.vmem %s829_s28, 32 }
 0x408   : > { %p764_p2 = scmp.lt.s32.totalorder %s762_s22, %s758_s20 }
 0x409   : > { %p760_p0 = pnand %p759_p13, %p1016_p12 }
 0x40b   : > { %p761_p1 = pneg %p760_p0 }
 0x40d   : > { %p766_p3 = pnand %p764_p2, %p761_p1 }
 0x40f   : > { %769 = shalt.err (!%p766_p3)
}
 0x410   : > { %s770_s16 = sshra.s32 %s1026_s14, 4  ;;  %s781_s13 = scalar_lea.hbm %s1074_s7, 24  ;;  %s771_s16 = int_to_ptr.hbm [resolvable:$true] %s770_s16 }
 0x411   : > { %s777_s11 = scalar_lea.hbm %s771_s16, %s753_s19  ;;  %p782_p8 = scmp.lt.s32.totalorder %s771_s16, %s1074_s7 }
 0x412   : > { %p778_p4 = scmp.ne.s32.totalorder %s771_s16, %s777_s11  ;;  %p783_p9 = scmp.lt.s32.totalorder %s781_s13, %s777_s11 }
 0x414   : > { %p779_p5 = pnand %p778_p4, %p1016_p12  ;;  %p784_p10 = por %p783_p9, %p782_p8 }
 0x416   : > { %p780_p7 = pneg %p779_p5 }
 0x418   : > { %p785_p11 = pnand %p784_p10, %p780_p7 }
 0x41a   : > { %788 = shalt.err (!%p785_p11)
}
 0x41b   : > { %s830_s20 = smov 128   ;;  %s831_s19 = smov 8  }
 0x41c   : > { %s1079_s28 = sshll.u32 %s1085_s18, 7 }
 0x41d   : > { %596 = dma.vmem_to_hbm [thread:$0]  (%p1016_p12), %s1024_s9, %s1079_s28, %s1026_s14, %s1007_s17, %s830_s20, %s830_s20, %s831_s19  }
 0x41e PF: > { %p704_p13 = scmp.ge.s32.totalorder %s824_s27, 2  ;;  %s605_s15 = sand.u32 1, %s812_s24  }
 0x41f   : > { %s606_s22 = scalar_lea.sflag [#allocation3], %s605_s15 }
 0x420   : > { %p701_p0 = pnand %p704_p13, %p914_p6 }
 0x422   : > { %p702_p1 = pneg %p701_p0 }
 0x424   : > { %807 = dma.done.wait (%p702_p1), %s606_s22, 256  }
 0x425   : > { %809 = vsyncadd (%p702_p1), %s606_s22, 4294967040  ;;  %p17_p2 = scmp.ge.s32.totalorder %s897_s30, 4   ;;  %s1080_s24 = smov %s816_s25 }
 0x426   : > { %s1081_s25 = smov %s820_s26  ;;  %s1082_s26 = smov %s908_s10 }
 0x427   : > { %s1083_s27 = smov %s897_s30  ;;  %19 = sbr.rel (!%p17_p2) target bundleno = 3 (0x3), region = 83 }
 0x42c   :  { %612 = vsyncpa [#allocation3], 1 }
 0x42d   :  { %614 = vsyncpa [#allocation3 + $0x1], 1 }

</bundles_post_ra>
